<compile_context>
chip_gen: v5e
topology: v5e:2x2
jax: 0.10.0
libtpu: 0.0.40
codegen_flags: <defaults>
</compile_context>

<pallas_src>
import functools
import math

import jax
import jax.numpy as jnp
from jax.experimental import pallas as pl
from jax.experimental.pallas import tpu as pltpu

LN_EPS = 1e-5  # PyTorch nn.LayerNorm default eps
VMEM_LIMIT = 48 * 1024 * 1024  # > 16/32 MiB defaults, < physical on v5e/v6e/v7x


def _cparams(*sem):
    return pltpu.CompilerParams(dimension_semantics=sem,
                                vmem_limit_bytes=VMEM_LIMIT)


def _row_block(m):
    # Largest power-of-two row tile that divides m; fall back to the full
    # array (the (8,128) rule allows blocks equal to full array dims).
    for rb in (512, 256, 128, 64, 32, 16, 8):
        if m % rb == 0:
            return rb
    return m


# ------------------------- shared in-kernel helpers -------------------------

def _ln(x, w, b):
    mu = jnp.mean(x, axis=-1, keepdims=True)
    var = jnp.mean(jnp.square(x - mu), axis=-1, keepdims=True)
    return (x - mu) * jax.lax.rsqrt(var + LN_EPS) * w + b


def _gelu_exact(x):
    # matches nn.GELU() (erf formulation)
    return 0.5 * x * (1.0 + jax.lax.erf(x / math.sqrt(2.0)))


# ----------------------------- small kernels --------------------------------

def _linear_kernel(x_ref, w_ref, b_ref, o_ref):
    x = x_ref[...].astype(jnp.bfloat16)
    o_ref[...] = (jnp.dot(x, w_ref[...], preferred_element_type=jnp.float32)
                  + b_ref[...])


def linear(x, w, b):
    M, K = x.shape
    N = w.shape[1]
    rb = _row_block(M)
    return pl.pallas_call(
        _linear_kernel,
        grid=(M // rb,),
        out_shape=jax.ShapeDtypeStruct((M, N), jnp.float32),
        in_specs=[pl.BlockSpec((rb, K), lambda i: (i, 0)),
                  pl.BlockSpec((K, N), lambda i: (0, 0)),
                  pl.BlockSpec((1, N), lambda i: (0, 0))],
        out_specs=pl.BlockSpec((rb, N), lambda i: (i, 0)),
        compiler_params=_cparams("parallel"),
    )(x, w.astype(jnp.bfloat16), b.reshape(1, N))


def _layernorm_kernel(x_ref, w_ref, b_ref, o_ref):
    o_ref[...] = _ln(x_ref[...], w_ref[...], b_ref[...])


def layernorm(x, w, b):
    M, E = x.shape
    rb = _row_block(M)
    return pl.pallas_call(
        _layernorm_kernel,
        grid=(M // rb,),
        out_shape=jax.ShapeDtypeStruct((M, E), jnp.float32),
        in_specs=[pl.BlockSpec((rb, E), lambda i: (i, 0)),
                  pl.BlockSpec((1, E), lambda i: (0, 0)),
                  pl.BlockSpec((1, E), lambda i: (0, 0))],
        out_specs=pl.BlockSpec((rb, E), lambda i: (i, 0)),
        compiler_params=_cparams("parallel"),
    )(x, w.reshape(1, E), b.reshape(1, E))


# --------------------------- transformer block -------------------------------
# Block = LN1 -> MHA -> +residual -> LN2 -> MLP -> +residual, split into three
# Pallas kernels; head split/merge happens wrapper-side (pure layout plumbing).

def _ln_qkv_kernel(x_ref, lnw, lnb, qkvw, qkvb, o_ref):
    h = _ln(x_ref[0], lnw[...], lnb[...]).astype(jnp.bfloat16)
    qkv = jnp.dot(h, qkvw[...], preferred_element_type=jnp.float32) + qkvb[...]
    o_ref[0] = qkv.astype(jnp.bfloat16)


def _attn_kernel(q_ref, k_ref, v_ref, o_ref, *, seq_real, scale):
    q = q_ref[0, 0]                                    # (S, dh) bf16
    k = k_ref[0, 0]
    v = v_ref[0, 0]
    s = jax.lax.dot_general(q, k, (((1,), (1,)), ((), ())),
                            preferred_element_type=jnp.float32) * scale
    # mask padded key columns (sequence was padded to a multiple of 8)
    key_idx = jax.lax.broadcasted_iota(jnp.int32, s.shape, 1)
    s = jnp.where(key_idx < seq_real, s, -1e30)
    m = jnp.max(s, axis=-1, keepdims=True)
    e = jnp.exp(s - m)
    denom = jnp.sum(e, axis=-1, keepdims=True)
    p = (e * pl.reciprocal(denom, approx=True)).astype(jnp.bfloat16)
    o_ref[0, 0] = jnp.dot(p, v, preferred_element_type=jnp.float32
                          ).astype(jnp.bfloat16)


def _proj_mlp_kernel(x_ref, ctx_ref, pw, pb, ln2w, ln2b, w1, b1, w2, b2, o_ref):
    x_in = x_ref[0]                                    # (S, E) f32 residual
    ctx = ctx_ref[0]                                   # (S, E) bf16 heads-merged
    attn = jnp.dot(ctx, pw[...], preferred_element_type=jnp.float32) + pb[...]
    x1 = x_in + attn                                   # residual 1
    h = _ln(x1, ln2w[...], ln2b[...]).astype(jnp.bfloat16)
    h = jnp.dot(h, w1[...], preferred_element_type=jnp.float32) + b1[...]
    h = _gelu_exact(h).astype(jnp.bfloat16)
    h = jnp.dot(h, w2[...], preferred_element_type=jnp.float32) + b2[...]
    o_ref[0] = x1 + h                                  # residual 2


def transformer_block(x, p, num_heads, seq_real):
    B, S, E = x.shape
    H = num_heads
    dh = E // H
    Hm = p["fc1_w"].shape[1]
    bf = lambda a: a.astype(jnp.bfloat16)

    def const2d(shape):
        return pl.BlockSpec(shape, lambda *_: (0, 0))

    # ---- (1) LN1 + fused QKV projection: one (S,E)x(E,3E) matmul ----
    qkv = pl.pallas_call(
        _ln_qkv_kernel,
        grid=(B,),
        out_shape=jax.ShapeDtypeStruct((B, S, 3 * E), jnp.bfloat16),
        in_specs=[pl.BlockSpec((1, S, E), lambda b: (b, 0, 0)),
                  const2d((1, E)), const2d((1, E)),
                  const2d((E, 3 * E)), const2d((1, 3 * E))],
        out_specs=pl.BlockSpec((1, S, 3 * E), lambda b: (b, 0, 0)),
        compiler_params=_cparams("parallel"),
    )(x, p["ln1_w"].reshape(1, E), p["ln1_b"].reshape(1, E),
      bf(p["qkv_w"]), p["qkv_b"].reshape(1, 3 * E))

    # head split: wrapper-side layout plumbing (XLA), not kernel compute
    qkv5 = qkv.reshape(B, S, 3, H, dh)
    q = qkv5[:, :, 0].transpose(0, 2, 1, 3)            # (B, H, S, dh)
    k = qkv5[:, :, 1].transpose(0, 2, 1, 3)
    v = qkv5[:, :, 2].transpose(0, 2, 1, 3)

    # ---- (2) attention core over a (B, H) parallel grid ----
    head_spec = pl.BlockSpec((1, 1, S, dh), lambda b, h: (b, h, 0, 0))
    ctx = pl.pallas_call(
        functools.partial(_attn_kernel, seq_real=seq_real,
                          scale=1.0 / math.sqrt(dh)),
        grid=(B, H),
        out_shape=jax.ShapeDtypeStruct((B, H, S, dh), jnp.bfloat16),
        in_specs=[head_spec, head_spec, head_spec],
        out_specs=head_spec,
        compiler_params=_cparams("parallel", "parallel"),
    )(q, k, v)

    # head merge back to (B, S, E): wrapper-side layout plumbing
    ctx = ctx.transpose(0, 2, 1, 3).reshape(B, S, E)

    # ---- (3) single (S,E)x(E,E) projection + residual + LN2 + MLP + residual ----
    return pl.pallas_call(
        _proj_mlp_kernel,
        grid=(B,),
        out_shape=jax.ShapeDtypeStruct((B, S, E), jnp.float32),
        in_specs=[pl.BlockSpec((1, S, E), lambda b: (b, 0, 0)),
                  pl.BlockSpec((1, S, E), lambda b: (b, 0, 0)),
                  const2d((E, E)), const2d((1, E)),
                  const2d((1, E)), const2d((1, E)),
                  const2d((E, Hm)), const2d((1, Hm)),
                  const2d((Hm, E)), const2d((1, E))],
        out_specs=pl.BlockSpec((1, S, E), lambda b: (b, 0, 0)),
        compiler_params=_cparams("parallel"),
    )(x, ctx,
      bf(p["proj_w"]), p["proj_b"].reshape(1, E),
      p["ln2_w"].reshape(1, E), p["ln2_b"].reshape(1, E),
      bf(p["fc1_w"]), p["fc1_b"].reshape(1, Hm),
      bf(p["fc2_w"]), p["fc2_b"].reshape(1, E))


# ------------------------------ full forward ---------------------------------

def vit_forward(x, params, *, patch_size, num_heads):
    B, C, H, W = x.shape
    p = patch_size
    gh, gw = H // p, W // p
    n_patches = gh * gw
    E = params["conv_w"].shape[0]

    # Patch extraction (glue): Conv2d(kernel=stride=patch) == patch-unfold + matmul.
    patches = x.reshape(B, C, gh, p, gw, p).transpose(0, 2, 4, 1, 3, 5)
    patches = patches.reshape(B * n_patches, C * p * p)
    w_pe = params["conv_w"].reshape(E, C * p * p).T          # (C*p*p, E)
    emb = linear(patches, w_pe, params["conv_b"])
    # TODO(synk): PatchEmbedding class body not given; assumed conv -> flatten ->
    # transpose -> LayerNorm (norm_layer is passed in the reference ctor).
    emb = layernorm(emb, params["pe_ln_w"], params["pe_ln_b"])
    emb = emb.reshape(B, n_patches, E)

    cls = jnp.broadcast_to(params["cls_token"], (B, 1, E))
    seq = jnp.concatenate([cls, emb], axis=1) + params["pos_embed"]  # drop p=0

    # pad sequence length to a multiple of 8 sublanes; padded keys are masked
    # inside the attention kernel and padded rows are never read at the end.
    S = n_patches + 1
    S_pad = ((S + 7) // 8) * 8
    if S_pad != S:
        seq = jnp.pad(seq, ((0, 0), (0, S_pad - S), (0, 0)))

    for blk in params["blocks"]:
        seq = transformer_block(seq, blk, num_heads, seq_real=S)

    # CLS-only final LayerNorm + head (LayerNorm / Linear are per-token, so
    # this equals norm(all tokens) -> head -> [:, 0, :] of the reference).
    cls_tok = seq[:, 0, :]                              # (B, E)
    cls_tok = layernorm(cls_tok, params["norm_w"], params["norm_b"])
    logits = linear(cls_tok, params["head_w"], params["head_b"])
    return logits                                       # pre_logits = Identity


# ------------------------------- parameters ----------------------------------

def init_params(key, *, in_channels, patch_size, embed_dims, num_blocks,
                num_heads, mlp_ratio, num_patches, num_classes):
    del num_heads
    hidden = int(embed_dims * mlp_ratio)
    keys = jax.random.split(key, 8 + num_blocks)

    def nrm(k, shape, std=0.02):
        return (std * jax.random.normal(k, shape)).astype(jnp.float32)

    params = {
        "conv_w": nrm(keys[0], (embed_dims, in_channels, patch_size, patch_size)),
        "conv_b": jnp.zeros((embed_dims,), jnp.float32),
        "pe_ln_w": jnp.ones((embed_dims,), jnp.float32),
        "pe_ln_b": jnp.zeros((embed_dims,), jnp.float32),
        "cls_token": nrm(keys[1], (1, 1, embed_dims)),
        "pos_embed": nrm(keys[2], (1, num_patches + 1, embed_dims)),
        "norm_w": jnp.ones((embed_dims,), jnp.float32),
        "norm_b": jnp.zeros((embed_dims,), jnp.float32),
        "head_w": nrm(keys[3], (embed_dims, num_classes)),
        "head_b": jnp.zeros((num_classes,), jnp.float32),
        "blocks": [],
    }
    for i in range(num_blocks):
        bk = jax.random.split(keys[8 + i], 4)
        params["blocks"].append({
            "ln1_w": jnp.ones((embed_dims,), jnp.float32),
            "ln1_b": jnp.zeros((embed_dims,), jnp.float32),
            "qkv_w": nrm(bk[0], (embed_dims, 3 * embed_dims)),
            "qkv_b": jnp.zeros((3 * embed_dims,), jnp.float32),
            "proj_w": nrm(bk[1], (embed_dims, embed_dims)),
            "proj_b": jnp.zeros((embed_dims,), jnp.float32),
            "ln2_w": jnp.ones((embed_dims,), jnp.float32),
            "ln2_b": jnp.zeros((embed_dims,), jnp.float32),
            "fc1_w": nrm(bk[2], (embed_dims, hidden)),
            "fc1_b": jnp.zeros((hidden,), jnp.float32),
            "fc2_w": nrm(bk[3], (hidden, embed_dims)),
            "fc2_b": jnp.zeros((embed_dims,), jnp.float32),
        })
    return params


if __name__ == "__main__":
    B, C, IMG, PATCH = 2, 4, 16, 4
    EMBED, HEADS, BLOCKS, CLASSES = 32, 4, 2, 10
    n_patches = (IMG // PATCH) ** 2            # 16 patches -> seq len 17 (pad 24)

    key = jax.random.PRNGKey(0)
    kx, kp = jax.random.split(key)
    x = jax.random.normal(kx, (B, C, IMG, IMG), dtype=jnp.float32)
    params = init_params(kp, in_channels=C, patch_size=PATCH, embed_dims=EMBED,
                         num_blocks=BLOCKS, num_heads=HEADS, mlp_ratio=4.0,
                         num_patches=n_patches, num_classes=CLASSES)

    out = vit_forward(x, params, patch_size=PATCH, num_heads=HEADS)
    out = jax.block_until_ready(out)
    assert out.shape == (B, CLASSES), out.shape
    print("KERNEL_OK")
</pallas_src>

<mosaic_0001>
module attributes {stable_mosaic.version = 11 : i64} {
  func.func @_linear_kernel(%arg0: i32, %arg1: memref<32x64xf32, #tpu.memory_space<vmem>>, %arg2: memref<64x32xbf16, #tpu.memory_space<vmem>>, %arg3: memref<1x32xf32, #tpu.memory_space<vmem>>, %arg4: memref<32x32xf32, #tpu.memory_space<vmem>>) attributes {dimension_semantics = [#tpu.dimension_semantics<parallel>], iteration_bounds = array<i64: 1>, scalar_prefetch = 0 : i64, scratch_operands = 0 : i64, tpu.core_type = #tpu.core_type<tc>, window_params = [{transform_indices = @transform_0, window_bounds = array<i64: 32, 64>}, {pipeline_mode = #tpu.pipeline_mode<synchronous>, transform_indices = @transform_1, window_bounds = array<i64: 64, 32>}, {pipeline_mode = #tpu.pipeline_mode<synchronous>, transform_indices = @transform_2, window_bounds = array<i64: 1, 32>}, {transform_indices = @transform_3, window_bounds = array<i64: 32, 32>}]} {
    %c0 = arith.constant 0 : index
    %c0_0 = arith.constant 0 : index
    %0 = vector.load %arg1[%c0, %c0_0] : memref<32x64xf32, #tpu.memory_space<vmem>>, vector<32x64xf32>
    %1 = arith.truncf %0 : vector<32x64xf32> to vector<32x64xbf16>
    %c0_1 = arith.constant 0 : index
    %c0_2 = arith.constant 0 : index
    %2 = vector.load %arg2[%c0_1, %c0_2] : memref<64x32xbf16, #tpu.memory_space<vmem>>, vector<64x32xbf16>
    %cst = arith.constant dense<0.000000e+00> : vector<32x32xf32>
    %3 = tpu.matmul %1, %2, %cst {dimension_numbers = #tpu.dot_dimension_numbers<[1], [0], [0], [1], [0, 0, 1, 1], [], []>} : vector<32x64xbf16>, vector<64x32xbf16>, vector<32x32xf32> -> vector<32x32xf32>
    %c0_3 = arith.constant 0 : index
    %c0_4 = arith.constant 0 : index
    %4 = vector.load %arg3[%c0_3, %c0_4] : memref<1x32xf32, #tpu.memory_space<vmem>>, vector<1x32xf32>
    %5 = vector.broadcast %4 : vector<1x32xf32> to vector<32x32xf32>
    %6 = arith.addf %3, %5 : vector<32x32xf32>
    %c0_5 = arith.constant 0 : index
    %c0_6 = arith.constant 0 : index
    %7 = vector.load %arg4[%c0_5, %c0_6] : memref<32x32xf32, #tpu.memory_space<vmem>>, vector<32x32xf32>
    tpu.vector_store %arg4[%c0_5, %c0_6], %6 {strides = array<i32>} : memref<32x32xf32, #tpu.memory_space<vmem>>, vector<32x32xf32>,
    return
  }
  func.func @transform_0(%arg0: i32) -> (i32, i32) {
    %c0_i32 = arith.constant 0 : i32
    %c0_i32_0 = arith.constant 0 : i32
    return %arg0, %c0_i32 : i32, i32
  }
  func.func @transform_1(%arg0: i32) -> (i32, i32) {
    %c0_i32 = arith.constant 0 : i32
    %c0_i32_0 = arith.constant 0 : i32
    %c0_i32_1 = arith.constant 0 : i32
    return %c0_i32, %c0_i32_0 : i32, i32
  }
  func.func @transform_2(%arg0: i32) -> (i32, i32) {
    %c0_i32 = arith.constant 0 : i32
    %c0_i32_0 = arith.constant 0 : i32
    %c0_i32_1 = arith.constant 0 : i32
    return %c0_i32, %c0_i32_0 : i32, i32
  }
  func.func @transform_3(%arg0: i32) -> (i32, i32) {
    %c0_i32 = arith.constant 0 : i32
    %c0_i32_0 = arith.constant 0 : i32
    return %arg0, %c0_i32 : i32, i32
  }
}

</mosaic_0001>

<bundles_post_ra>
// kernel: tpu_custom_call.1
= control target key start
LH: loop header
LB: loop body
LE: loop exit
PB: predicated region body
PF: predicated region fallthrough
CT: control target
= control target key end

     0   :  { %s220_s0 = inlined_call_operand.vmem [shape: f32[32,64], index: 0, kind: input, shape index: {}]   ;;  %s221_s1 = inlined_call_operand.vmem [shape: bf16[64,32], index: 1, kind: input, shape index: {}]   ;;  %s222_s2 = inlined_call_operand.vmem [shape: f32[1,32], index: 2, kind: input, shape index: {}]   ;;  %s223_s3 = inlined_call_operand.hbm [shape: f32[32,32], index: 3, kind: output, shape index: {}]  }
   0x1   :  { %v128_v0 = vld [vmem:[%s221_s1 + $0x18] sm:$0xff]  ;;  %v127_v1 = vld [vmem:[%s221_s1 + $0x10] sm:$0xff] }
   0x2   :  { %69 = vmatpush.bf16.msra.mxu0 %v128_v0  ;;  %129 = vmatpush.bf16.msra.mxu1 %v128_v0 }
   0x3   :  { %8 = vsyncpa [#allocation3], 0  ;;  %v126_v2 = vld [vmem:[%s221_s1 + $0x8] sm:$0xff]  ;;  %v125_v3 = vld [vmem:[%s221_s1] sm:$0xff]  ;;  %vm58_vm0 = vcmask 523264   ;;  %vm84_vm1 = vcmask 261120  }
   0x4   :  { %v16_v4 = vld [vmem:[%s220_s0] sm:$0xff]  ;;  %v17_v5 = vld [vmem:[%s220_s0 + $0x8] sm:$0xff]  ;;  %v18_v6 = vld [vmem:[%s220_s0 + $0x10] sm:$0xff]  ;;  %s95_s5 = sshll.u32 %s223_s3, 4  ;;  %s165_s6 = smov 8   ;;  %s96_s5 = int_to_ptr.hbm [resolvable:$true] %s95_s5 }
   0x5   :  { %v19_v7 = vld [vmem:[%s220_s0 + $0x18] sm:$0xff]  ;;  %v20_v8 = vpack.c.bf16 %v17_v5, %v16_v4  ;;  %v136_v10 = vld [vmem:[%s222_s2] ss:$0 sm:$0xff]  ;;  %s163_s0 = smov [#allocation2]   ;;  %s164_s2 = smov 128  }
   0x6   :  { %70 = vmatpush.bf16.msra.mxu0 %v127_v1  ;;  %130 = vmatpush.bf16.msra.mxu1 %v127_v1  ;;  %v21_v9 = vpack.c.bf16 %v19_v7, %v18_v6  ;;  %s93_s29 = sshll.u32 %s163_s0, 4  ;;  %s94_s29 = int_to_ptr.vmem [resolvable:$true] %s93_s29 }
   0xa   :  { %71 = vmatpush.bf16.msra.mxu0 %v126_v2  ;;  %131 = vmatpush.bf16.msra.mxu1 %v126_v2 }
   0xe   :  { %72 = vmatpush.bf16.msra.mxu0 %v125_v3  ;;  %132 = vmatpush.bf16.msra.mxu1 %v125_v3 }
  0x11   :  { %123 = vmatmul.msk.bf16.vlgmr.msra.gmra.mxu0 %vm58_vm0, %v20_v8  ;;  %124 = vmatmul.msk.bf16.vlgmr.msra.gmra.mxu1 %vm58_vm0, %v21_v9 }
  0x8e   :  { %v74_v11 = vpop.f32.mrf.mxu0  ;;  %v79_v12 = vpop.f32.mrf.mxu1 }
  0x8f   :  { %v75_v13 = vadd.f32 %v136_v10, %v74_v11  ;;  %v80_v14 = vadd.f32 %v136_v10, %v79_v12 }
  0x91   :  { %85 = vst.msk [vmem:[#allocation2] sm:$0xff] %vm84_vm1, %v75_v13 }
  0x92   :  { %87 = vst.msk [vmem:[#allocation2 + $0x10] sm:$0xff] %vm84_vm1, %v80_v14 }
  0x96   :  { %v76_v15 = vpop.f32.mrf.mxu0  ;;  %v81_v16 = vpop.f32.mrf.mxu1 }
  0x97   :  { %v77_v17 = vadd.f32 %v136_v10, %v76_v15  ;;  %v82_v18 = vadd.f32 %v136_v10, %v81_v16 }
  0x99   :  { %86 = vst.msk [vmem:[#allocation2 + $0x8] sm:$0xff] %vm84_vm1, %v77_v17 }
  0x9a   :  { %88 = vst.msk [vmem:[#allocation2 + $0x18] sm:$0xff] %vm84_vm1, %v82_v18 }
  0x9b   :  { %101 = dma.vmem_to_hbm [thread:$0]  %s94_s29, 512, %s96_s5, [#allocation3], %s164_s2, %s164_s2, %s165_s6  }
  0x9c   :  { %161 = dma.done.wait [#allocation3], 512  }
  0x9d   :  { %162 = vsyncadd [#allocation3], 4294966784 }
  0x9e   :  { %106 = vsyncpa [#allocation3], 1 }

</bundles_post_ra>
